<compile_context>
chip_gen: v5e
topology: v5e:2x2
jax: 0.10.0
libtpu: 0.0.40
codegen_flags: <defaults>
</compile_context>

<pallas_src>
import jax
import jax.numpy as jnp
from jax.experimental import pallas as pl
from jax.experimental.pallas import tpu as pltpu

_EPS = 1e-5
_VMEM_BUDGET = 48 * 1024 * 1024      # ~75% of v7x's 64 MiB/TC (safe on all gens)
_VMEM_LIMIT_CAP = 64 * 1024 * 1024


def _round_up(x, m):
    return ((x + m - 1) // m) * m


def _layernorm_f32(x_f32, gamma, beta):
    mean = jnp.mean(x_f32, axis=-1, keepdims=True)
    centered = x_f32 - mean
    var = jnp.mean(centered * centered, axis=-1, keepdims=True)
    inv_std = jax.lax.rsqrt(var + _EPS)
    return centered * inv_std * gamma + beta


def _prenorm_kernel(x_ref, gamma_ref, beta_ref, w_ref, b_ref, o_ref):
    """Single grid axis over rows; full (D, D) weight resident in VMEM."""
    x = x_ref[...].astype(jnp.float32)                        # (TN, D) f32
    normed = _layernorm_f32(x, gamma_ref[...], beta_ref[...])
    normed = normed.astype(w_ref.dtype)                       # bf16-path friendly
    # Weight already in (in, out) layout: plain MXU contraction, no trans-B.
    y = jnp.dot(normed, w_ref[...], preferred_element_type=jnp.float32)
    y = y + b_ref[...]
    # Residual: reuse the f32 x already in registers/VMEM (no extra cast pass).
    o_ref[...] = (y + x).astype(o_ref.dtype)


def _prenorm_kernel_coltiled(x_ref, xc_ref, gamma_ref, beta_ref, w_ref, b_ref,
                             o_ref):
    """Two grid axes: (weight output-column tiles, row tiles), rows innermost."""
    x = x_ref[...].astype(jnp.float32)                        # (TN, D) full row
    normed = _layernorm_f32(x, gamma_ref[...], beta_ref[...])
    normed = normed.astype(w_ref.dtype)
    y = jnp.dot(normed, w_ref[...], preferred_element_type=jnp.float32)  # (TN, TD)
    y = y + b_ref[...]
    # Residual columns come in as their own (TN, TD) block (no dynamic lane slice).
    o_ref[...] = (y + xc_ref[...].astype(jnp.float32)).astype(o_ref.dtype)


def _vmem_bytes(TN, TD, D, x_itemsize, w_itemsize):
    col_tiled = TD != D
    w_bufs = 2 if col_tiled else 1            # Buffered(1) on the resident weight
    weight = w_bufs * D * TD * w_itemsize
    x_in = 2 * TN * D * x_itemsize            # double-buffered full-row x
    x_res = (2 * TN * TD * x_itemsize) if col_tiled else 0
    out = 2 * TN * TD * x_itemsize
    params = 4 * D * 4                        # gamma / beta / bias (f32)
    f32_tmp = 4 * TN * D * 4                  # f32 intermediates + compiler scratch
    return weight + x_in + x_res + out + params + f32_tmp + (2 << 20)


def _pick_row_tile(N, block_rows):
    if block_rows is None:
        block_rows = 512                      # v5e/v6e sweet spot (auto-shrunk below)
    if N >= 128 and block_rows >= 128:
        tn = min(block_rows, _round_up(N, 128))
        return max(128, (tn // 128) * 128)
    return min(max(8, (block_rows // 8) * 8), _round_up(N, 8))


def _build_call(kernel, grid, in_specs, out_specs, out_shape, dim_sem, vmem_limit):
    return pl.pallas_call(
        kernel,
        out_shape=out_shape,
        grid_spec=pltpu.PrefetchScalarGridSpec(
            num_scalar_prefetch=0,
            grid=grid,
            in_specs=in_specs,
            out_specs=out_specs,
        ),
        compiler_params=pltpu.CompilerParams(
            dimension_semantics=dim_sem,
            vmem_limit_bytes=vmem_limit,
        ),
    )


def prenorm_residual(x, gamma, beta, weight, bias, *,
                     block_rows=None, col_block=None, matmul_dtype=None):
    """forward(x) = Linear(LayerNorm(x)) + x.

    x: (B, S, D); gamma/beta/bias: (D,); weight: (D, D) in PyTorch (out, in) layout.
    """
    B, S, D = x.shape
    N = B * S
    x2 = x.reshape(N, D)

    # MXU operand dtype: defaults to the input dtype (exact f32 path for f32
    # inputs).  Pass matmul_dtype=jnp.bfloat16 for 2-4x MXU throughput and half
    # the resident-weight VMEM (most valuable on v5e) if accuracy allows.
    param_dtype = jnp.dtype(matmul_dtype) if matmul_dtype is not None else x.dtype
    x_itemsize = jnp.dtype(x.dtype).itemsize
    w_itemsize = jnp.dtype(param_dtype).itemsize

    # --- row tile (matmul M dimension) ---------------------------------------
    TN = _pick_row_tile(N, block_rows)

    # --- weight output-column tile (VMEM guard for large D / v7x) ------------
    if col_block is not None:
        TD = int(col_block)
        if TD != D and (D % TD != 0 or TD % 128 != 0):
            raise ValueError("col_block must divide D and be a multiple of 128")
    else:
        TD = D
        # Halve the column tile (keeping it a 128-multiple that divides D) until
        # the resident weight + pipelined tiles fit the conservative budget.
        while TD % 256 == 0 and _vmem_bytes(TN, TD, D, x_itemsize, w_itemsize) > _VMEM_BUDGET:
            TD //= 2
    # If still over budget, shrink the row tile as well.
    while TN > 128 and TN % 256 == 0 and _vmem_bytes(TN, TD, D, x_itemsize, w_itemsize) > _VMEM_BUDGET:
        TN //= 2

    N_pad = _round_up(N, TN)
    if N_pad != N:
        # Padded zero rows are safe (var=0 -> rsqrt(eps) finite); sliced off below.
        x2 = jnp.pad(x2, ((0, N_pad - N), (0, 0)))

    # --- operands -------------------------------------------------------------
    gamma2 = gamma.reshape(1, D).astype(jnp.float32)
    beta2 = beta.reshape(1, D).astype(jnp.float32)
    b2 = bias.reshape(1, D).astype(jnp.float32)
    # One-time XLA transpose to (in, out): the kernel then issues a native
    # (M,K)x(K,N) MXU push instead of a trans-B contraction that may pay a
    # per-grid-step XLU transpose of the resident DxD operand.
    wt = jnp.transpose(weight).astype(param_dtype)            # (D_in, D_out)

    vmem_limit = int(min(max(_vmem_bytes(TN, TD, D, x_itemsize, w_itemsize),
                             16 * 1024 * 1024), _VMEM_LIMIT_CAP))
    out_shape = jax.ShapeDtypeStruct((N_pad, D), x.dtype)

    def _make(use_single_buffer):
        # Single-buffer the grid-invariant operands (block index never changes).
        res_kw = {"pipeline_mode": pl.Buffered(1)} if use_single_buffer else {}
        if TD == D:
            grid = (N_pad // TN,)
            in_specs = [
                pl.BlockSpec((TN, D), lambda i: (i, 0)),            # x rows
                pl.BlockSpec((1, D), lambda i: (0, 0), **res_kw),   # gamma
                pl.BlockSpec((1, D), lambda i: (0, 0), **res_kw),   # beta
                pl.BlockSpec((D, D), lambda i: (0, 0), **res_kw),   # weight (resident)
                pl.BlockSpec((1, D), lambda i: (0, 0), **res_kw),   # bias
            ]
            out_specs = pl.BlockSpec((TN, D), lambda i: (i, 0))
            call = _build_call(_prenorm_kernel, grid, in_specs, out_specs,
                               out_shape, ("parallel",), vmem_limit)
            return call, (x2, gamma2, beta2, wt, b2)

        # Column-tiled path: grid = (col tiles, row tiles); rows innermost so
        # each weight column block is DMA'd from HBM exactly once.
        grid = (D // TD, N_pad // TN)
        in_specs = [
            pl.BlockSpec((TN, D), lambda c, r: (r, 0)),             # x full row (LayerNorm)
            pl.BlockSpec((TN, TD), lambda c, r: (r, c)),            # x columns (residual)
            pl.BlockSpec((1, D), lambda c, r: (0, 0), **res_kw),    # gamma
            pl.BlockSpec((1, D), lambda c, r: (0, 0), **res_kw),    # beta
            pl.BlockSpec((D, TD), lambda c, r: (0, c)),             # weight column block
            pl.BlockSpec((1, TD), lambda c, r: (0, c)),             # bias column block
        ]
        out_specs = pl.BlockSpec((TN, TD), lambda c, r: (r, c))
        call = _build_call(_prenorm_kernel_coltiled, grid, in_specs, out_specs,
                           out_shape, ("parallel", "parallel"), vmem_limit)
        return call, (x2, x2, gamma2, beta2, wt, b2)

    try:
        call, args = _make(True)
        out = call(*args)
    except Exception:
        # Fallback for environments where BlockSpec(pipeline_mode=...) is
        # unavailable; identical math, default double-buffering.
        call, args = _make(False)
        out = call(*args)

    return out[:N].reshape(B, S, D)


def _reference(x, gamma, beta, weight, bias):
    mean = jnp.mean(x, axis=-1, keepdims=True)
    var = jnp.mean((x - mean) ** 2, axis=-1, keepdims=True)
    normed = (x - mean) / jnp.sqrt(var + _EPS) * gamma + beta
    return jnp.einsum("bsd,od->bso", normed, weight) + bias + x


if __name__ == "__main__":
    key = jax.random.PRNGKey(0)

    # --- test 1: tiny shape, single-axis grid (full-D resident weight) -------
    B, S, D = 2, 8, 32
    k1, k2, k3, key = jax.random.split(key, 4)
    x = jax.random.normal(k1, (B, S, D), dtype=jnp.float32)
    gamma = jnp.ones((D,), dtype=jnp.float32)
    beta = jnp.zeros((D,), dtype=jnp.float32)
    weight = jax.random.normal(k2, (D, D), dtype=jnp.float32) / jnp.sqrt(D)
    bias = jax.random.normal(k3, (D,), dtype=jnp.float32) * 0.01

    out = prenorm_residual(x, gamma, beta, weight, bias, block_rows=8)
    jax.block_until_ready(out)
    ref = _reference(x, gamma, beta, weight, bias)
    assert jnp.allclose(out, ref, atol=1e-4, rtol=1e-4), "mismatch (single-axis path)"

    # --- test 2: force the column-tiled (large-D / v7x) path ------------------
    B2, S2, D2 = 2, 8, 256
    k1, k2, k3, k4, k5, key = jax.random.split(key, 6)
    xb = jax.random.normal(k1, (B2, S2, D2), dtype=jnp.float32)
    gammab = 1.0 + 0.1 * jax.random.normal(k2, (D2,), dtype=jnp.float32)
    betab = 0.1 * jax.random.normal(k3, (D2,), dtype=jnp.float32)
    weightb = jax.random.normal(k4, (D2, D2), dtype=jnp.float32) / jnp.sqrt(D2)
    biasb = jax.random.normal(k5, (D2,), dtype=jnp.float32) * 0.01

    out2 = prenorm_residual(xb, gammab, betab, weightb, biasb,
                            block_rows=8, col_block=128)
    jax.block_until_ready(out2)
    ref2 = _reference(xb, gammab, betab, weightb, biasb)
    # Looser tolerance (deeper contraction / matmul rounding); still catches
    # any structural (indexing / residual / blockspec) bug, which would be O(1).
    assert jnp.allclose(out2, ref2, atol=2e-2, rtol=2e-2), "mismatch (column-tiled path)"

    print("KERNEL_OK")
</pallas_src>

<mosaic_0001>
module attributes {stable_mosaic.version = 11 : i64} {
  func.func @_prenorm_kernel(%arg0: i32, %arg1: memref<8x32xf32, #tpu.memory_space<vmem>>, %arg2: memref<1x32xf32, #tpu.memory_space<vmem>>, %arg3: memref<1x32xf32, #tpu.memory_space<vmem>>, %arg4: memref<32x32xf32, #tpu.memory_space<vmem>>, %arg5: memref<1x32xf32, #tpu.memory_space<vmem>>, %arg6: memref<8x32xf32, #tpu.memory_space<vmem>>) attributes {dimension_semantics = [#tpu.dimension_semantics<parallel>], iteration_bounds = array<i64: 2>, scalar_prefetch = 0 : i64, scratch_operands = 0 : i64, tpu.core_type = #tpu.core_type<tc>, window_params = [{transform_indices = @transform_0, window_bounds = array<i64: 8, 32>}, {pipeline_mode = #tpu.pipeline_mode<synchronous>, transform_indices = @transform_1, window_bounds = array<i64: 1, 32>}, {pipeline_mode = #tpu.pipeline_mode<synchronous>, transform_indices = @transform_2, window_bounds = array<i64: 1, 32>}, {pipeline_mode = #tpu.pipeline_mode<synchronous>, transform_indices = @transform_3, window_bounds = array<i64: 32, 32>}, {pipeline_mode = #tpu.pipeline_mode<synchronous>, transform_indices = @transform_4, window_bounds = array<i64: 1, 32>}, {transform_indices = @transform_5, window_bounds = array<i64: 8, 32>}]} {
    %c0 = arith.constant 0 : index
    %c0_0 = arith.constant 0 : index
    %0 = vector.load %arg1[%c0, %c0_0] : memref<8x32xf32, #tpu.memory_space<vmem>>, vector<8x32xf32>
    %c0_1 = arith.constant 0 : index
    %c0_2 = arith.constant 0 : index
    %1 = vector.load %arg2[%c0_1, %c0_2] : memref<1x32xf32, #tpu.memory_space<vmem>>, vector<1x32xf32>
    %c0_3 = arith.constant 0 : index
    %c0_4 = arith.constant 0 : index
    %2 = vector.load %arg3[%c0_3, %c0_4] : memref<1x32xf32, #tpu.memory_space<vmem>>, vector<1x32xf32>
    %cst = arith.constant dense<0.000000e+00> : vector<8xf32>
    %3 = vector.multi_reduction <add>, %0, %cst [1] : vector<8x32xf32> to vector<8xf32>
    %4 = vector.shape_cast %3 : vector<8xf32> to vector<8x1xf32>
    %cst_5 = arith.constant 3.200000e+01 : f32
    %5 = vector.broadcast %cst_5 : f32 to vector<8x1xf32>
    %6 = arith.divf %4, %5 : vector<8x1xf32>
    %7 = vector.broadcast %6 : vector<8x1xf32> to vector<8x32xf32>
    %8 = arith.subf %0, %7 : vector<8x32xf32>
    %9 = arith.mulf %8, %8 : vector<8x32xf32>
    %cst_6 = arith.constant dense<0.000000e+00> : vector<8xf32>
    %10 = vector.multi_reduction <add>, %9, %cst_6 [1] : vector<8x32xf32> to vector<8xf32>
    %11 = vector.shape_cast %10 : vector<8xf32> to vector<8x1xf32>
    %cst_7 = arith.constant 3.200000e+01 : f32
    %12 = vector.broadcast %cst_7 : f32 to vector<8x1xf32>
    %13 = arith.divf %11, %12 : vector<8x1xf32>
    %cst_8 = arith.constant 9.99999974E-6 : f32
    %14 = vector.broadcast %cst_8 : f32 to vector<8x1xf32>
    %15 = arith.addf %13, %14 : vector<8x1xf32>
    %16 = math.rsqrt %15 : vector<8x1xf32>
    %17 = vector.broadcast %16 : vector<8x1xf32> to vector<8x32xf32>
    %18 = arith.mulf %8, %17 : vector<8x32xf32>
    %19 = vector.broadcast %1 : vector<1x32xf32> to vector<8x32xf32>
    %20 = arith.mulf %18, %19 : vector<8x32xf32>
    %21 = vector.broadcast %2 : vector<1x32xf32> to vector<8x32xf32>
    %22 = arith.addf %20, %21 : vector<8x32xf32>
    %c0_9 = arith.constant 0 : index
    %c0_10 = arith.constant 0 : index
    %23 = vector.load %arg4[%c0_9, %c0_10] : memref<32x32xf32, #tpu.memory_space<vmem>>, vector<32x32xf32>
    %cst_11 = arith.constant dense<0.000000e+00> : vector<8x32xf32>
    %24 = tpu.matmul %22, %23, %cst_11 {dimension_numbers = #tpu.dot_dimension_numbers<[1], [0], [0], [1], [0, 0, 1, 1], [], []>} : vector<8x32xf32>, vector<32x32xf32>, vector<8x32xf32> -> vector<8x32xf32>
    %c0_12 = arith.constant 0 : index
    %c0_13 = arith.constant 0 : index
    %25 = vector.load %arg5[%c0_12, %c0_13] : memref<1x32xf32, #tpu.memory_space<vmem>>, vector<1x32xf32>
    %26 = vector.broadcast %25 : vector<1x32xf32> to vector<8x32xf32>
    %27 = arith.addf %24, %26 : vector<8x32xf32>
    %28 = arith.addf %27, %0 : vector<8x32xf32>
    %c0_14 = arith.constant 0 : index
    %c0_15 = arith.constant 0 : index
    %29 = vector.load %arg6[%c0_14, %c0_15] : memref<8x32xf32, #tpu.memory_space<vmem>>, vector<8x32xf32>
    tpu.vector_store %arg6[%c0_14, %c0_15], %28 {strides = array<i32>} : memref<8x32xf32, #tpu.memory_space<vmem>>, vector<8x32xf32>,
    return
  }
  func.func @transform_0(%arg0: i32) -> (i32, i32) {
    %c0_i32 = arith.constant 0 : i32
    %c0_i32_0 = arith.constant 0 : i32
    return %arg0, %c0_i32 : i32, i32
  }
  func.func @transform_1(%arg0: i32) -> (i32, i32) {
    %c0_i32 = arith.constant 0 : i32
    %c0_i32_0 = arith.constant 0 : i32
    %c0_i32_1 = arith.constant 0 : i32
    return %c0_i32, %c0_i32_0 : i32, i32
  }
  func.func @transform_2(%arg0: i32) -> (i32, i32) {
    %c0_i32 = arith.constant 0 : i32
    %c0_i32_0 = arith.constant 0 : i32
    %c0_i32_1 = arith.constant 0 : i32
    return %c0_i32, %c0_i32_0 : i32, i32
  }
  func.func @transform_3(%arg0: i32) -> (i32, i32) {
    %c0_i32 = arith.constant 0 : i32
    %c0_i32_0 = arith.constant 0 : i32
    %c0_i32_1 = arith.constant 0 : i32
    return %c0_i32, %c0_i32_0 : i32, i32
  }
  func.func @transform_4(%arg0: i32) -> (i32, i32) {
    %c0_i32 = arith.constant 0 : i32
    %c0_i32_0 = arith.constant 0 : i32
    %c0_i32_1 = arith.constant 0 : i32
    return %c0_i32, %c0_i32_0 : i32, i32
  }
  func.func @transform_5(%arg0: i32) -> (i32, i32) {
    %c0_i32 = arith.constant 0 : i32
    %c0_i32_0 = arith.constant 0 : i32
    return %arg0, %c0_i32 : i32, i32
  }
}

module attributes {stable_mosaic.version = 11 : i64} {
  func.func @_prenorm_kernel(%arg0: i32, %arg1: memref<8x32xf32, #tpu.memory_space<vmem>>, %arg2: memref<1x32xf32, #tpu.memory_space<vmem>>, %arg3: memref<1x32xf32, #tpu.memory_space<vmem>>, %arg4: memref<32x32xf32, #tpu.memory_space<vmem>>, %arg5: memref<1x32xf32, #tpu.memory_space<vmem>>, %arg6: memref<8x32xf32, #tpu.memory_space<vmem>>) attributes {dimension_semantics = [#tpu.dimension_semantics<parallel>], iteration_bounds = array<i64: 2>, scalar_prefetch = 0 : i64, scratch_operands = 0 : i64, tpu.core_type = #tpu.core_type<tc>, window_params = [{transform_indices = @transform_0, window_bounds = array<i64: 8, 32>}, {pipeline_mode = #tpu.pipeline_mode<synchronous>, transform_indices = @transform_1, window_bounds = array<i64: 1, 32>}, {pipeline_mode = #tpu.pipeline_mode<synchronous>, transform_indices = @transform_2, window_bounds = array<i64: 1, 32>}, {pipeline_mode = #tpu.pipeline_mode<synchronous>, transform_indices = @transform_3, window_bounds = array<i64: 32, 32>}, {pipeline_mode = #tpu.pipeline_mode<synchronous>, transform_indices = @transform_4, window_bounds = array<i64: 1, 32>}, {transform_indices = @transform_5, window_bounds = array<i64: 8, 32>}]} {
    %c0 = arith.constant 0 : index
    %c0_0 = arith.constant 0 : index
    %0 = vector.load %arg1[%c0, %c0_0] : memref<8x32xf32, #tpu.memory_space<vmem>>, vector<8x32xf32>
    %c0_1 = arith.constant 0 : index
    %c0_2 = arith.constant 0 : index
    %1 = vector.load %arg2[%c0_1, %c0_2] : memref<1x32xf32, #tpu.memory_space<vmem>>, vector<1x32xf32>
    %c0_3 = arith.constant 0 : index
    %c0_4 = arith.constant 0 : index
    %2 = vector.load %arg3[%c0_3, %c0_4] : memref<1x32xf32, #tpu.memory_space<vmem>>, vector<1x32xf32>
    %cst = arith.constant dense<0.000000e+00> : vector<8xf32>
    %3 = vector.multi_reduction <add>, %0, %cst [1] : vector<8x32xf32> to vector<8xf32>
    %4 = vector.shape_cast %3 : vector<8xf32> to vector<8x1xf32>
    %cst_5 = arith.constant 3.200000e+01 : f32
    %5 = vector.broadcast %cst_5 : f32 to vector<8x1xf32>
    %6 = arith.divf %4, %5 : vector<8x1xf32>
    %7 = vector.broadcast %6 : vector<8x1xf32> to vector<8x32xf32>
    %8 = arith.subf %0, %7 : vector<8x32xf32>
    %9 = arith.mulf %8, %8 : vector<8x32xf32>
    %cst_6 = arith.constant dense<0.000000e+00> : vector<8xf32>
    %10 = vector.multi_reduction <add>, %9, %cst_6 [1] : vector<8x32xf32> to vector<8xf32>
    %11 = vector.shape_cast %10 : vector<8xf32> to vector<8x1xf32>
    %cst_7 = arith.constant 3.200000e+01 : f32
    %12 = vector.broadcast %cst_7 : f32 to vector<8x1xf32>
    %13 = arith.divf %11, %12 : vector<8x1xf32>
    %cst_8 = arith.constant 9.99999974E-6 : f32
    %14 = vector.broadcast %cst_8 : f32 to vector<8x1xf32>
    %15 = arith.addf %13, %14 : vector<8x1xf32>
    %16 = math.rsqrt %15 : vector<8x1xf32>
    %17 = vector.broadcast %16 : vector<8x1xf32> to vector<8x32xf32>
    %18 = arith.mulf %8, %17 : vector<8x32xf32>
    %19 = vector.broadcast %1 : vector<1x32xf32> to vector<8x32xf32>
    %20 = arith.mulf %18, %19 : vector<8x32xf32>
    %21 = vector.broadcast %2 : vector<1x32xf32> to vector<8x32xf32>
    %22 = arith.addf %20, %21 : vector<8x32xf32>
    %c0_9 = arith.constant 0 : index
    %c0_10 = arith.constant 0 : index
    %23 = vector.load %arg4[%c0_9, %c0_10] : memref<32x32xf32, #tpu.memory_space<vmem>>, vector<32x32xf32>
    %cst_11 = arith.constant dense<0.000000e+00> : vector<8x32xf32>
    %24 = tpu.matmul %22, %23, %cst_11 {dimension_numbers = #tpu.dot_dimension_numbers<[1], [0], [0], [1], [0, 0, 1, 1], [], []>} : vector<8x32xf32>, vector<32x32xf32>, vector<8x32xf32> -> vector<8x32xf32>
    %c0_12 = arith.constant 0 : index
    %c0_13 = arith.constant 0 : index
    %25 = vector.load %arg5[%c0_12, %c0_13] : memref<1x32xf32, #tpu.memory_space<vmem>>, vector<1x32xf32>
    %26 = vector.broadcast %25 : vector<1x32xf32> to vector<8x32xf32>
    %27 = arith.addf %24, %26 : vector<8x32xf32>
    %28 = arith.addf %27, %0 : vector<8x32xf32>
    %c0_14 = arith.constant 0 : index
    %c0_15 = arith.constant 0 : index
    %29 = vector.load %arg6[%c0_14, %c0_15] : memref<8x32xf32, #tpu.memory_space<vmem>>, vector<8x32xf32>
    tpu.vector_store %arg6[%c0_14, %c0_15], %28 {strides = array<i32>} : memref<8x32xf32, #tpu.memory_space<vmem>>, vector<8x32xf32>,
    return
  }
  func.func @transform_0(%arg0: i32) -> (i32, i32) {
    %c0_i32 = arith.constant 0 : i32
    %c0_i32_0 = arith.constant 0 : i32
    return %arg0, %c0_i32 : i32, i32
  }
  func.func @transform_1(%arg0: i32) -> (i32, i32) {
    %c0_i32 = arith.constant 0 : i32
    %c0_i32_0 = arith.constant 0 : i32
    %c0_i32_1 = arith.constant 0 : i32
    return %c0_i32, %c0_i32_0 : i32, i32
  }
  func.func @transform_2(%arg0: i32) -> (i32, i32) {
    %c0_i32 = arith.constant 0 : i32
    %c0_i32_0 = arith.constant 0 : i32
    %c0_i32_1 = arith.constant 0 : i32
    return %c0_i32, %c0_i32_0 : i32, i32
  }
  func.func @transform_3(%arg0: i32) -> (i32, i32) {
    %c0_i32 = arith.constant 0 : i32
    %c0_i32_0 = arith.constant 0 : i32
    %c0_i32_1 = arith.constant 0 : i32
    return %c0_i32, %c0_i32_0 : i32, i32
  }
  func.func @transform_4(%arg0: i32) -> (i32, i32) {
    %c0_i32 = arith.constant 0 : i32
    %c0_i32_0 = arith.constant 0 : i32
    %c0_i32_1 = arith.constant 0 : i32
    return %c0_i32, %c0_i32_0 : i32, i32
  }
  func.func @transform_5(%arg0: i32) -> (i32, i32) {
    %c0_i32 = arith.constant 0 : i32
    %c0_i32_0 = arith.constant 0 : i32
    return %arg0, %c0_i32 : i32, i32
  }
}

</mosaic_0001>

<bundles_post_ra>
// kernel: tpu_custom_call.1
= control target key start
LH: loop header
LB: loop body
LE: loop exit
PB: predicated region body
PF: predicated region fallthrough
CT: control target
= control target key end

     0   :  { %10 = vsyncpa [#allocation3], 0  ;;  %s898_s0 = inlined_call_operand.hbm [shape: f32[16,32], index: 0, kind: input, shape index: {}]   ;;  %s899_s1 = inlined_call_operand.hbm [shape: f32[1,32], index: 1, kind: input, shape index: {}]   ;;  %s900_s2 = inlined_call_operand.vmem [shape: f32[1,32], index: 2, kind: input, shape index: {}]   ;;  %s901_s3 = inlined_call_operand.hbm [shape: f32[32,32], index: 3, kind: input, shape index: {}]   ;;  %s902_s4 = inlined_call_operand.vmem [shape: f32[1,32], index: 4, kind: input, shape index: {}]   ;;  %s903_s5 = inlined_call_operand.hbm [shape: f32[16,32], index: 5, kind: output, shape index: {}]  }
   0x1   :  { %12 = vsyncpa [#allocation3 + $0x1], 0 }
   0x2   :  { %13 = vsyncpa [#allocation6], 0 }
   0x3   :  { %14 = vsyncpa [#allocation4], 0 }
   0x4   :  { %16 = vsyncpa [#allocation4 + $0x1], 0  ;;  %s743_s18 = smov 0   ;;  %s745_s19 = smov 0  }
   0x5   :  { %s747_s20 = smov 0   ;;  %s749_s21 = smov 0  }
   0x6 LB: > { %s764_s22 = sadd.s32 4294967295, %s706_s21   ;;  %s452_s23 = sadd.s32 4294967294, %s706_s21   ;;  %s706_s21 = sphi %s749_s21, %s913_s21   ;;  %s702_s20 = sphi %s747_s20, %s912_s20   ;;  %s698_s19 = sphi %s745_s19, %s911_s19   ;;  %s694_s18 = sphi %s743_s18, %s910_s18  }
   0x7   : > { %p42_p0 = scmp.ne.s32.totalorder %s698_s19, %s694_s18  ;;  %p43_p1 = scmp.eq.s32.totalorder %s764_s22, 0 }
   0x8   : > { %p150_p2 = scmp.eq.s32.totalorder %s764_s22, 1  ;;  %p156_p3 = scmp.eq.s32.totalorder %s452_s23, 1 }
   0x9   : > { %p773_p4 = por %p43_p1, %p42_p0  ;;  %p453_p5 = scmp.ge.s32.totalorder %s706_s21, 1 }
   0xa   : > { %p778_p6 = por %p156_p3, %p42_p0  ;;  %p163_p7 = scmp.lt.s32.totalorder %s706_s21, 3 }
   0xb   : > { %s175_s28 = sshll.u32 %s899_s1, 4  ;;  %s708_s30 = smov [#allocation5]   ;;  %s176_s28 = int_to_ptr.hbm [resolvable:$true] %s175_s28 }
   0xc   : > { %p786_p8 = pnand %p453_p5, %p163_p7  ;;  %s177_s6 = sshll.u32 %s708_s30, 4  ;;  %s178_s6 = int_to_ptr.vmem [resolvable:$true] %s177_s6 }
   0xd   : > { %s189_s9 = sshll.u32 %s901_s3, 4  ;;  %s709_s10 = smov [#allocation7]   ;;  %s190_s9 = int_to_ptr.hbm [resolvable:$true] %s189_s9 }
   0xe   : > { %p481_p10 = pneg %p786_p8  ;;  %s191_s11 = sshll.u32 %s709_s10, 4  ;;  %s192_s11 = int_to_ptr.vmem [resolvable:$true] %s191_s11 }
   0xf   : > { %s710_s12 = smov 128   ;;  %s711_s13 = smov 8  }
  0x10   : > { %p482_p11 = pnand %p481_p10, %p43_p1  ;;  %s799_s14 = sadd.s32 1, %s706_s21  }
  0x11   : > { %s26_s15 = ssub.s32 %s706_s21, %s799_s14  ;;  %s29_s16 = sadd.s32 1, %s702_s20 }
  0x12   : > { %484 = dma.hbm_to_vmem [thread:$0]  (!%p482_p11), %s176_s28, 16, %s178_s6, [#allocation6]  }
  0x13   : > { %487 = dma.hbm_to_vmem [thread:$0]  (!%p482_p11), %s190_s9, 512, %s192_s11, [#allocation6], %s710_s12, %s710_s12, %s711_s13  }
  0x14   : > { %p27_p12 = scmp.eq.s32.totalorder %s26_s15, 0  ;;  %p36_p13 = scmp.ne.s32.totalorder %s702_s20, %s698_s19 }
  0x15   : > { %p37_p0 = scmp.eq.s32.totalorder %s706_s21, 0  ;;  %p498_p7 = scmp.lt.s32.totalorder %s706_s21, 2 }
  0x16   : > { %s808_s17 = scalar_select %p27_p12, %s702_s20, %s29_s16  }
  0x17   : > { %p38_p3 = por %p37_p0, %p36_p13  ;;  %p812_p5 = por %p150_p2, %p36_p13 }
  0x18   : > { %s208_s26 = sand.u32 1, %s702_s20   ;;  %s458_s28 = sshll.u32 %s706_s21, 3 }
  0x19   : > { %s457_s27 = sshll.u32 %s208_s26, 3  ;;  %s216_s7 = scalar_lea.hbm %s898_s0, %s458_s28 }
  0x1a   : > { %s212_s8 = scalar_lea.vmem [#allocation2], %s457_s27  ;;  %s218_s10 = sshll.u32 %s216_s7, 4  ;;  %s219_s10 = int_to_ptr.hbm [resolvable:$true] %s218_s10 }
  0x1b   : > { %s220_s9 = sshll.u32 %s212_s8, 4  ;;  %p822_p10 = pnand %p498_p7, %p38_p3  ;;  %s221_s9 = int_to_ptr.vmem [resolvable:$true] %s220_s9 }
  0x1c   : > { %s209_s12 = scalar_lea.sflag [#allocation3], %s208_s26  ;;  %s606_s13 = sshra.s32 %s219_s10, 4  ;;  %s607_s13 = int_to_ptr.hbm [resolvable:$true] %s606_s13 }
  0x1d   : > { %s608_s15 = scalar_lea.hbm %s607_s13, 8  ;;  %p610_p11 = pneg %p822_p10 }
  0x1e   : > { %p609_p2 = scmp.ne.s32.totalorder %s607_s13, %s608_s15  ;;  %s613_s28 = scalar_lea.hbm %s898_s0, 16 }
  0x1f   : > { %p614_p0 = scmp.lt.s32.totalorder %s607_s13, %s898_s0  ;;  %p615_p3 = scmp.lt.s32.totalorder %s613_s28, %s608_s15 }
  0x20   : > { %p611_p12 = pnand %p610_p11, %p609_p2 }
  0x21   : > { %p616_p7 = por %p615_p3, %p614_p0 }
  0x22   : > { %p612_p13 = pneg %p611_p12 }
  0x24   : > { %p617_p9 = pnand %p616_p7, %p612_p13 }
  0x26   : > { %620 = shalt.err (!%p617_p9)
}
  0x27   : > { %491 = dma.hbm_to_vmem [thread:$0]  (!%p822_p10), %s219_s10, 128, %s221_s9, %s209_s12  }
  0x28   : > { %229 = sbr.rel (%p786_p8) target bundleno = 450 (0x1c2), region = 40  ;;  %s839_s26 = sand.u32 (!%p786_p8), 1, %s698_s19  }
  0x29   : > { %s460_s7 = sshll.u32 (!%p786_p8), %s839_s26, 3  ;;  %s232_s8 = scalar_lea.sflag (!%p786_p8), [#allocation3], %s839_s26 }
  0x2a   : > { %s235_s13 = scalar_lea.vmem (!%p786_p8), [#allocation2], %s460_s7 }
  0x2d   : > { %681 = dma.done.wait (%p773_p4), %s232_s8, 128  }
  0x2e   : > { %683 = vsyncadd (%p773_p4), %s232_s8, 4294967168 }
  0x2f   : > { %685 = dma.done.wait (%p43_p1), [#allocation6], 528  }
  0x30   : > { %687 = vsyncadd (%p43_p1), [#allocation6], 4294966768  ;;  %vm276_vm0 = vcmask 261120   ;;  %v273_v0 = vld [vmem:[%s235_s13] sm:$0xff]  ;;  %v712_v2 = vmov 32.0   ;;  %v314_v17 = vld [vmem:[#allocation7] sm:$0xff] }
  0x31   : > { %v277_v1 = vsel %vm276_vm0, %v273_v0, 0.0  ;;  %542 = vrcp.f32 %v712_v2  ;;  %v317_v14 = vld [vmem:[#allocation7 + $0x18] sm:$0xff]  ;;  %v316_v15 = vld [vmem:[#allocation7 + $0x10] sm:$0xff]  ;;  %v315_v16 = vld [vmem:[#allocation7 + $0x8] sm:$0xff]  ;;  %s466_s9 = sshll.u32 %s764_s22, 3  ;;  %s272_s27 = scalar_lea.vmem [#allocation8], %s460_s7 }
  0x32   : > { %278 = vadd.xlane.f32.xlu0 %v277_v1  ;;  %337 = vmatpush.msra.mxu0 %v317_v14  ;;  %v539_v27 = vld [vmem:[#allocation5] ss:$0 sm:$0xff]  ;;  %v540_v30 = vld [vmem:[%s900_s2] ss:$0 sm:$0xff]  ;;  %s358_s16 = scalar_lea.hbm %s903_s5, %s466_s9  ;;  %s360_s28 = sshll.u32 %s272_s27, 4  ;;  %s361_s28 = int_to_ptr.vmem [resolvable:$true] %s360_s28 }
  0x33   : > { %v541_v33 = vld [vmem:[%s902_s4] ss:$0 sm:$0xff]  ;;  %s362_s30 = sshll.u32 %s358_s16, 4  ;;  %s348_s22 = scalar_lea.sflag [#allocation4], %s839_s26  ;;  %s363_s30 = int_to_ptr.hbm [resolvable:$true] %s362_s30 }
  0x34   : > { %338 = vmatpush.msra.mxu0 %v316_v15  ;;  %s650_s6 = sshra.s32 %s363_s30, 4  ;;  %s656_s7 = scalar_lea.hbm %s903_s5, 16  ;;  %s651_s6 = int_to_ptr.hbm [resolvable:$true] %s650_s6 }
  0x35   : > { %s652_s8 = scalar_lea.hbm %s651_s6, 8  ;;  %p657_p9 = scmp.lt.s32.totalorder %s651_s6, %s903_s5 }
  0x36   : > { %339 = vmatpush.msra.mxu0 %v315_v16  ;;  %p653_p1 = scmp.ne.s32.totalorder %s651_s6, %s652_s8  ;;  %p658_p10 = scmp.lt.s32.totalorder %s656_s7, %s652_s8 }
  0x37   : > { %v543_v3 = vpop.eup %542 }
  0x38   : > { %v281_v4 = vmul.f32 32.0, %v543_v3  ;;  %vm285_vm1 = vweird.f32 %v543_v3  ;;  %340 = vmatpush.msra.mxu0 %v314_v17  ;;  %p654_p4 = pnand %p653_p1, %p812_p5  ;;  %p659_p2 = por %p658_p10, %p657_p9 }
  0x3a   : > { %v282_v5 = vsub.f32 1.0, %v281_v4  ;;  %p655_p8 = pneg %p654_p4 }
  0x3c   : > { %v283_v6 = vmul.f32 %v543_v3, %v282_v5  ;;  %p660_p11 = pnand %p659_p2, %p655_p8 }
  0x3e   : > { %v284_v7 = vadd.f32 %v543_v3, %v283_v6 }
  0x40   : > { %v286_v8 = vsel %vm285_vm1, %v543_v3, %v284_v7 }
  0xa5   : > { %v279_v9 = vpop.xlane.xlu0 %278 }
  0xa6   : > { %v287_v10 = vmul.f32 %v286_v8, %v279_v9 }
  0xa8   : > { %v288_v11 = vsub.f32 %v273_v0, %v287_v10 }
  0xaa   : > { %v289_v12 = vmul.f32 %v288_v11, %v288_v11 }
  0xac   : > { %v290_v13 = vsel %vm276_vm0, %v289_v12, 0.0 }
  0xad   : > { %291 = vadd.xlane.f32.xlu0 %v290_v13 }
 0x120   : > { %v292_v18 = vpop.xlane.xlu0 %291 }
 0x121   : > { %v293_v19 = vmul.f32 %v292_v18, %v286_v8 }
 0x123   : > { %v294_v20 = vadd.f32 1e-05, %v293_v19 }
 0x125   : > { %544 = vrsqrt.f32 %v294_v20  ;;  %vm301_vm3 = vweird.f32 %v294_v20 }
 0x12b   : > { %v545_v21 = vpop.eup %544 }
 0x12c   : > { %v296_v22 = vmul.f32 %v545_v21, %v294_v20  ;;  %vm302_vm2 = vweird.f32 %v545_v21 }
 0x12d   : > { %vm303_vm4 = vmor %vm301_vm3, %vm302_vm2 }
 0x12e   : > { %v297_v23 = vmul.f32 %v545_v21, %v296_v22 }
 0x130   : > { %v298_v24 = vmul.f32 0.5, %v297_v23 }
 0x132   : > { %v299_v25 = vsub.f32 1.5, %v298_v24 }
 0x134   : > { %v300_v26 = vmul.f32 %v545_v21, %v299_v25 }
 0x136   : > { %v304_v28 = vsel %vm303_vm4, %v545_v21, %v300_v26 }
 0x137   : > { %v305_v29 = vmul.f32 %v304_v28, %v288_v11 }
 0x139   : > { %v309_v31 = vmul.f32 %v539_v27, %v305_v29 }
 0x13b   : > { %v313_v32 = vadd.f32 %v540_v30, %v309_v31 }
 0x13d   : > { %464 = vmatmul.msk.f32.vlgmr.msra.gmra.mxu0 %vm276_vm0, %v313_v32 }
 0x1ba   : > { %v342_v34 = vpop.f32.mrf.mxu0 }
 0x1bb   : > { %v343_v35 = vadd.f32 %v541_v33, %v342_v34 }
 0x1bd   : > { %v345_v36 = vadd.f32 %v343_v35, %v273_v0 }
 0x1bf   : > { %346 = vst.msk [vmem:[%s272_s27] sm:$0xff] %vm276_vm0, %v345_v36 }
 0x1c0   : > { %663 = shalt.err (!%p660_p11)
}
 0x1c1   : > { %479 = dma.vmem_to_hbm [thread:$0]  (%p812_p5), %s361_s28, 128, %s363_s30, %s348_s22  }
 0x1c2 PF: > { %s374_s26 = sand.u32 1, %s694_s18   ;;  %p909_p12 = scmp.ge.s32.totalorder %s706_s21, 2 }
 0x1c3   : > { %s375_s10 = scalar_lea.sflag [#allocation4], %s374_s26 }
 0x1c4   : > { %p493_p13 = pnand %p909_p12, %p778_p6 }
 0x1c6   : > { %p494_p0 = pneg %p493_p13 }
 0x1c8   : > { %689 = dma.done.wait (%p494_p0), %s375_s10, 128  }
 0x1c9   : > { %691 = vsyncadd (%p494_p0), %s375_s10, 4294967168  ;;  %p19_p3 = scmp.ge.s32.totalorder %s799_s14, 4   ;;  %s910_s18 = smov %s698_s19 }
 0x1ca   : > { %s911_s19 = smov %s702_s20  ;;  %s912_s20 = smov %s808_s17 }
 0x1cb   : > { %s913_s21 = smov %s799_s14  ;;  %21 = sbr.rel (!%p19_p3) target bundleno = 6 (0x6), region = 93 }
 0x1d0   :  { %381 = vsyncpa [#allocation3], 1 }
 0x1d1   :  { %383 = vsyncpa [#allocation3 + $0x1], 1 }
 0x1d2   :  { %384 = vsyncpa [#allocation6], 1 }
 0x1d3   :  { %385 = vsyncpa [#allocation4], 1 }
 0x1d4   :  { %387 = vsyncpa [#allocation4 + $0x1], 1 }

// kernel: tpu_custom_call.1
= control target key start
LH: loop header
LB: loop body
LE: loop exit
PB: predicated region body
PF: predicated region fallthrough
CT: control target
= control target key end

     0   :  { %10 = vsyncpa [#allocation3], 0  ;;  %s898_s0 = inlined_call_operand.hbm [shape: f32[16,32], index: 0, kind: input, shape index: {}]   ;;  %s899_s1 = inlined_call_operand.hbm [shape: f32[1,32], index: 1, kind: input, shape index: {}]   ;;  %s900_s2 = inlined_call_operand.vmem [shape: f32[1,32], index: 2, kind: input, shape index: {}]   ;;  %s901_s3 = inlined_call_operand.hbm [shape: f32[32,32], index: 3, kind: input, shape index: {}]   ;;  %s902_s4 = inlined_call_operand.vmem [shape: f32[1,32], index: 4, kind: input, shape index: {}]   ;;  %s903_s5 = inlined_call_operand.hbm [shape: f32[16,32], index: 5, kind: output, shape index: {}]  }
   0x1   :  { %12 = vsyncpa [#allocation3 + $0x1], 0 }
   0x2   :  { %13 = vsyncpa [#allocation6], 0 }
   0x3   :  { %14 = vsyncpa [#allocation4], 0 }
   0x4   :  { %16 = vsyncpa [#allocation4 + $0x1], 0  ;;  %s743_s18 = smov 0   ;;  %s745_s19 = smov 0  }
   0x5   :  { %s747_s20 = smov 0   ;;  %s749_s21 = smov 0  }
   0x6 LB: > { %s764_s22 = sadd.s32 4294967295, %s706_s21   ;;  %s452_s23 = sadd.s32 4294967294, %s706_s21   ;;  %s706_s21 = sphi %s749_s21, %s913_s21   ;;  %s702_s20 = sphi %s747_s20, %s912_s20   ;;  %s698_s19 = sphi %s745_s19, %s911_s19   ;;  %s694_s18 = sphi %s743_s18, %s910_s18  }
   0x7   : > { %p42_p0 = scmp.ne.s32.totalorder %s698_s19, %s694_s18  ;;  %p43_p1 = scmp.eq.s32.totalorder %s764_s22, 0 }
   0x8   : > { %p150_p2 = scmp.eq.s32.totalorder %s764_s22, 1  ;;  %p156_p3 = scmp.eq.s32.totalorder %s452_s23, 1 }
   0x9   : > { %p773_p4 = por %p43_p1, %p42_p0  ;;  %p453_p5 = scmp.ge.s32.totalorder %s706_s21, 1 }
   0xa   : > { %p778_p6 = por %p156_p3, %p42_p0  ;;  %p163_p7 = scmp.lt.s32.totalorder %s706_s21, 3 }
   0xb   : > { %s175_s28 = sshll.u32 %s899_s1, 4  ;;  %s708_s30 = smov [#allocation5]   ;;  %s176_s28 = int_to_ptr.hbm [resolvable:$true] %s175_s28 }
   0xc   : > { %p786_p8 = pnand %p453_p5, %p163_p7  ;;  %s177_s6 = sshll.u32 %s708_s30, 4  ;;  %s178_s6 = int_to_ptr.vmem [resolvable:$true] %s177_s6 }
   0xd   : > { %s189_s9 = sshll.u32 %s901_s3, 4  ;;  %s709_s10 = smov [#allocation7]   ;;  %s190_s9 = int_to_ptr.hbm [resolvable:$true] %s189_s9 }
   0xe   : > { %p481_p10 = pneg %p786_p8  ;;  %s191_s11 = sshll.u32 %s709_s10, 4  ;;  %s192_s11 = int_to_ptr.vmem [resolvable:$true] %s191_s11 }
   0xf   : > { %s710_s12 = smov 128   ;;  %s711_s13 = smov 8  }
  0x10   : > { %p482_p11 = pnand %p481_p10, %p43_p1  ;;  %s799_s14 = sadd.s32 1, %s706_s21  }
  0x11   : > { %s26_s15 = ssub.s32 %s706_s21, %s799_s14  ;;  %s29_s16 = sadd.s32 1, %s702_s20 }
  0x12   : > { %484 = dma.hbm_to_vmem [thread:$0]  (!%p482_p11), %s176_s28, 16, %s178_s6, [#allocation6]  }
  0x13   : > { %487 = dma.hbm_to_vmem [thread:$0]  (!%p482_p11), %s190_s9, 512, %s192_s11, [#allocation6], %s710_s12, %s710_s12, %s711_s13  }
  0x14   : > { %p27_p12 = scmp.eq.s32.totalorder %s26_s15, 0  ;;  %p36_p13 = scmp.ne.s32.totalorder %s702_s20, %s698_s19 }
  0x15   : > { %p37_p0 = scmp.eq.s32.totalorder %s706_s21, 0  ;;  %p498_p7 = scmp.lt.s32.totalorder %s706_s21, 2 }
  0x16   : > { %s808_s17 = scalar_select %p27_p12, %s702_s20, %s29_s16  }
  0x17   : > { %p38_p3 = por %p37_p0, %p36_p13  ;;  %p812_p5 = por %p150_p2, %p36_p13 }
  0x18   : > { %s208_s26 = sand.u32 1, %s702_s20   ;;  %s458_s28 = sshll.u32 %s706_s21, 3 }
  0x19   : > { %s457_s27 = sshll.u32 %s208_s26, 3  ;;  %s216_s7 = scalar_lea.hbm %s898_s0, %s458_s28 }
  0x1a   : > { %s212_s8 = scalar_lea.vmem [#allocation2], %s457_s27  ;;  %s218_s10 = sshll.u32 %s216_s7, 4  ;;  %s219_s10 = int_to_ptr.hbm [resolvable:$true] %s218_s10 }
  0x1b   : > { %s220_s9 = sshll.u32 %s212_s8, 4  ;;  %p822_p10 = pnand %p498_p7, %p38_p3  ;;  %s221_s9 = int_to_ptr.vmem [resolvable:$true] %s220_s9 }
  0x1c   : > { %s209_s12 = scalar_lea.sflag [#allocation3], %s208_s26  ;;  %s606_s13 = sshra.s32 %s219_s10, 4  ;;  %s607_s13 = int_to_ptr.hbm [resolvable:$true] %s606_s13 }
  0x1d   : > { %s608_s15 = scalar_lea.hbm %s607_s13, 8  ;;  %p610_p11 = pneg %p822_p10 }
  0x1e   : > { %p609_p2 = scmp.ne.s32.totalorder %s607_s13, %s608_s15  ;;  %s613_s28 = scalar_lea.hbm %s898_s0, 16 }
  0x1f   : > { %p614_p0 = scmp.lt.s32.totalorder %s607_s13, %s898_s0  ;;  %p615_p3 = scmp.lt.s32.totalorder %s613_s28, %s608_s15 }
  0x20   : > { %p611_p12 = pnand %p610_p11, %p609_p2 }
  0x21   : > { %p616_p7 = por %p615_p3, %p614_p0 }
  0x22   : > { %p612_p13 = pneg %p611_p12 }
  0x24   : > { %p617_p9 = pnand %p616_p7, %p612_p13 }
  0x26   : > { %620 = shalt.err (!%p617_p9)
}
  0x27   : > { %491 = dma.hbm_to_vmem [thread:$0]  (!%p822_p10), %s219_s10, 128, %s221_s9, %s209_s12  }
  0x28   : > { %229 = sbr.rel (%p786_p8) target bundleno = 450 (0x1c2), region = 40  ;;  %s839_s26 = sand.u32 (!%p786_p8), 1, %s698_s19  }
  0x29   : > { %s460_s7 = sshll.u32 (!%p786_p8), %s839_s26, 3  ;;  %s232_s8 = scalar_lea.sflag (!%p786_p8), [#allocation3], %s839_s26 }
  0x2a   : > { %s235_s13 = scalar_lea.vmem (!%p786_p8), [#allocation2], %s460_s7 }
  0x2d   : > { %681 = dma.done.wait (%p773_p4), %s232_s8, 128  }
  0x2e   : > { %683 = vsyncadd (%p773_p4), %s232_s8, 4294967168 }
  0x2f   : > { %685 = dma.done.wait (%p43_p1), [#allocation6], 528  }
  0x30   : > { %687 = vsyncadd (%p43_p1), [#allocation6], 4294966768  ;;  %vm276_vm0 = vcmask 261120   ;;  %v273_v0 = vld [vmem:[%s235_s13] sm:$0xff]  ;;  %v712_v2 = vmov 32.0   ;;  %v314_v17 = vld [vmem:[#allocation7] sm:$0xff] }
  0x31   : > { %v277_v1 = vsel %vm276_vm0, %v273_v0, 0.0  ;;  %542 = vrcp.f32 %v712_v2  ;;  %v317_v14 = vld [vmem:[#allocation7 + $0x18] sm:$0xff]  ;;  %v316_v15 = vld [vmem:[#allocation7 + $0x10] sm:$0xff]  ;;  %v315_v16 = vld [vmem:[#allocation7 + $0x8] sm:$0xff]  ;;  %s466_s9 = sshll.u32 %s764_s22, 3  ;;  %s272_s27 = scalar_lea.vmem [#allocation8], %s460_s7 }
  0x32   : > { %278 = vadd.xlane.f32.xlu0 %v277_v1  ;;  %337 = vmatpush.msra.mxu0 %v317_v14  ;;  %v539_v27 = vld [vmem:[#allocation5] ss:$0 sm:$0xff]  ;;  %v540_v30 = vld [vmem:[%s900_s2] ss:$0 sm:$0xff]  ;;  %s358_s16 = scalar_lea.hbm %s903_s5, %s466_s9  ;;  %s360_s28 = sshll.u32 %s272_s27, 4  ;;  %s361_s28 = int_to_ptr.vmem [resolvable:$true] %s360_s28 }
  0x33   : > { %v541_v33 = vld [vmem:[%s902_s4] ss:$0 sm:$0xff]  ;;  %s362_s30 = sshll.u32 %s358_s16, 4  ;;  %s348_s22 = scalar_lea.sflag [#allocation4], %s839_s26  ;;  %s363_s30 = int_to_ptr.hbm [resolvable:$true] %s362_s30 }
  0x34   : > { %338 = vmatpush.msra.mxu0 %v316_v15  ;;  %s650_s6 = sshra.s32 %s363_s30, 4  ;;  %s656_s7 = scalar_lea.hbm %s903_s5, 16  ;;  %s651_s6 = int_to_ptr.hbm [resolvable:$true] %s650_s6 }
  0x35   : > { %s652_s8 = scalar_lea.hbm %s651_s6, 8  ;;  %p657_p9 = scmp.lt.s32.totalorder %s651_s6, %s903_s5 }
  0x36   : > { %339 = vmatpush.msra.mxu0 %v315_v16  ;;  %p653_p1 = scmp.ne.s32.totalorder %s651_s6, %s652_s8  ;;  %p658_p10 = scmp.lt.s32.totalorder %s656_s7, %s652_s8 }
  0x37   : > { %v543_v3 = vpop.eup %542 }
  0x38   : > { %v281_v4 = vmul.f32 32.0, %v543_v3  ;;  %vm285_vm1 = vweird.f32 %v543_v3  ;;  %340 = vmatpush.msra.mxu0 %v314_v17  ;;  %p654_p4 = pnand %p653_p1, %p812_p5  ;;  %p659_p2 = por %p658_p10, %p657_p9 }
  0x3a   : > { %v282_v5 = vsub.f32 1.0, %v281_v4  ;;  %p655_p8 = pneg %p654_p4 }
  0x3c   : > { %v283_v6 = vmul.f32 %v543_v3, %v282_v5  ;;  %p660_p11 = pnand %p659_p2, %p655_p8 }
  0x3e   : > { %v284_v7 = vadd.f32 %v543_v3, %v283_v6 }
  0x40   : > { %v286_v8 = vsel %vm285_vm1, %v543_v3, %v284_v7 }
  0xa5   : > { %v279_v9 = vpop.xlane.xlu0 %278 }
  0xa6   : > { %v287_v10 = vmul.f32 %v286_v8, %v279_v9 }
  0xa8   : > { %v288_v11 = vsub.f32 %v273_v0, %v287_v10 }
  0xaa   : > { %v289_v12 = vmul.f32 %v288_v11, %v288_v11 }
  0xac   : > { %v290_v13 = vsel %vm276_vm0, %v289_v12, 0.0 }
  0xad   : > { %291 = vadd.xlane.f32.xlu0 %v290_v13 }
 0x120   : > { %v292_v18 = vpop.xlane.xlu0 %291 }
 0x121   : > { %v293_v19 = vmul.f32 %v292_v18, %v286_v8 }
 0x123   : > { %v294_v20 = vadd.f32 1e-05, %v293_v19 }
 0x125   : > { %544 = vrsqrt.f32 %v294_v20  ;;  %vm301_vm3 = vweird.f32 %v294_v20 }
 0x12b   : > { %v545_v21 = vpop.eup %544 }
 0x12c   : > { %v296_v22 = vmul.f32 %v545_v21, %v294_v20  ;;  %vm302_vm2 = vweird.f32 %v545_v21 }
 0x12d   : > { %vm303_vm4 = vmor %vm301_vm3, %vm302_vm2 }
 0x12e   : > { %v297_v23 = vmul.f32 %v545_v21, %v296_v22 }
 0x130   : > { %v298_v24 = vmul.f32 0.5, %v297_v23 }
 0x132   : > { %v299_v25 = vsub.f32 1.5, %v298_v24 }
 0x134   : > { %v300_v26 = vmul.f32 %v545_v21, %v299_v25 }
 0x136   : > { %v304_v28 = vsel %vm303_vm4, %v545_v21, %v300_v26 }
 0x137   : > { %v305_v29 = vmul.f32 %v304_v28, %v288_v11 }
 0x139   : > { %v309_v31 = vmul.f32 %v539_v27, %v305_v29 }
 0x13b   : > { %v313_v32 = vadd.f32 %v540_v30, %v309_v31 }
 0x13d   : > { %464 = vmatmul.msk.f32.vlgmr.msra.gmra.mxu0 %vm276_vm0, %v313_v32 }
 0x1ba   : > { %v342_v34 = vpop.f32.mrf.mxu0 }
 0x1bb   : > { %v343_v35 = vadd.f32 %v541_v33, %v342_v34 }
 0x1bd   : > { %v345_v36 = vadd.f32 %v343_v35, %v273_v0 }
 0x1bf   : > { %346 = vst.msk [vmem:[%s272_s27] sm:$0xff] %vm276_vm0, %v345_v36 }
 0x1c0   : > { %663 = shalt.err (!%p660_p11)
}
 0x1c1   : > { %479 = dma.vmem_to_hbm [thread:$0]  (%p812_p5), %s361_s28, 128, %s363_s30, %s348_s22  }
 0x1c2 PF: > { %s374_s26 = sand.u32 1, %s694_s18   ;;  %p909_p12 = scmp.ge.s32.totalorder %s706_s21, 2 }
 0x1c3   : > { %s375_s10 = scalar_lea.sflag [#allocation4], %s374_s26 }
 0x1c4   : > { %p493_p13 = pnand %p909_p12, %p778_p6 }
 0x1c6   : > { %p494_p0 = pneg %p493_p13 }
 0x1c8   : > { %689 = dma.done.wait (%p494_p0), %s375_s10, 128  }
 0x1c9   : > { %691 = vsyncadd (%p494_p0), %s375_s10, 4294967168  ;;  %p19_p3 = scmp.ge.s32.totalorder %s799_s14, 4   ;;  %s910_s18 = smov %s698_s19 }
 0x1ca   : > { %s911_s19 = smov %s702_s20  ;;  %s912_s20 = smov %s808_s17 }
 0x1cb   : > { %s913_s21 = smov %s799_s14  ;;  %21 = sbr.rel (!%p19_p3) target bundleno = 6 (0x6), region = 93 }
 0x1d0   :  { %381 = vsyncpa [#allocation3], 1 }
 0x1d1   :  { %383 = vsyncpa [#allocation3 + $0x1], 1 }
 0x1d2   :  { %384 = vsyncpa [#allocation6], 1 }
 0x1d3   :  { %385 = vsyncpa [#allocation4], 1 }
 0x1d4   :  { %387 = vsyncpa [#allocation4 + $0x1], 1 }

</bundles_post_ra>
